<compile_context>
chip_gen: v5e
topology: v5e:2x2
jax: 0.10.0
libtpu: 0.0.40
codegen_flags: <defaults>
</compile_context>

<pallas_src>
import functools

import jax
import jax.numpy as jnp
from jax import lax
from jax.experimental import pallas as pl
from jax.experimental.pallas import tpu as pltpu


def _dropout_kernel(seed_ref, x_ref, o_ref, *, rate, tile_rows):
    """seed_ref: (1,) int32 scalar-prefetch; x_ref/o_ref: (tile_rows, lanes)."""
    r, c = x_ref.shape
    pid = pl.program_id(0)  # top-level only (never inside pl.when / cond)

    # Global flat element index for this tile (int32).
    row = lax.broadcasted_iota(jnp.int32, (r, c), 0)
    col = lax.broadcasted_iota(jnp.int32, (r, c), 1)
    idx = (pid * tile_rows + row) * c + col

    # Counter-based hash RNG: golden-ratio spread + murmur3 fmix32 finalizer.
    # Pure u32 xor/shift/mul/add -> VPU-only, portable to Mosaic & interpret.
    h = idx.astype(jnp.uint32) * jnp.uint32(0x9E3779B9)
    h = h + seed_ref[0].astype(jnp.uint32)
    h = h ^ (h >> 16)
    h = h * jnp.uint32(0x85EBCA6B)
    h = h ^ (h >> 13)
    h = h * jnp.uint32(0xC2B2AE35)
    h = h ^ (h >> 16)

    # Keep decision by integer threshold on the top 31 bits (no float uniform).
    r31 = (h >> 1).astype(jnp.int32)                       # uniform in [0, 2^31)
    thresh = min(int(round(rate * (1 << 31))), (1 << 31) - 1)
    keep = r31 >= jnp.int32(thresh)                        # P(drop) = rate

    # Inverted dropout in the input dtype (no upcast; bf16 stays bf16).
    scale = 1.0 / (1.0 - rate)
    o_ref[...] = jnp.where(keep, x_ref[...] * scale, 0.0).astype(o_ref.dtype)


def _dropout_pallas(x, *, rate, seed):
    orig_shape = x.shape
    flat = x.reshape(-1)
    total = flat.shape[0]

    # Pad to a multiple of 128 so we can always build a lane-dense slab.
    pad = (-total) % 128
    if pad:
        flat = jnp.pad(flat, (0, pad))
    padded = total + pad

    # Lane-dense layout: widest last dim (multiple of 128) that divides `padded`.
    lanes = 128
    for cand in (4096, 2048, 1024, 512, 256, 128):
        if padded % cand == 0:
            lanes = cand
            break
    rows = padded // lanes

    # Largest row-tile under ~2 MiB (x2 in/out x2 double-buffers ~ 8 MiB VMEM,
    # safe under the 16/32 MiB scoped defaults on v5e/v6e/v7x).
    max_tile_bytes = 2 * 1024 * 1024
    max_rows = max(1, max_tile_bytes // (lanes * x.dtype.itemsize))
    tile_rows = rows  # full-extent block is always layout-legal (fallback)
    for cand in range(min(rows, max_rows), 0, -1):
        if rows % cand == 0 and (cand % 8 == 0 or cand == rows):
            tile_rows = cand
            break
    grid = (rows // tile_rows,)

    x2 = flat.reshape(rows, lanes)
    seed_arr = jnp.array([seed], dtype=jnp.int32)
    kernel = functools.partial(_dropout_kernel, rate=rate, tile_rows=tile_rows)

    out2 = pl.pallas_call(
        kernel,
        out_shape=jax.ShapeDtypeStruct((rows, lanes), x.dtype),
        grid_spec=pltpu.PrefetchScalarGridSpec(
            num_scalar_prefetch=1,
            grid=grid,
            in_specs=[pl.BlockSpec((tile_rows, lanes), lambda i, seed_ref: (i, 0))],
            out_specs=pl.BlockSpec((tile_rows, lanes), lambda i, seed_ref: (i, 0)),
        ),
        compiler_params=pltpu.CompilerParams(
            dimension_semantics=("parallel",),
            vmem_limit_bytes=32 * 1024 * 1024,
        ),
    )(seed_arr, x2)

    out_flat = out2.reshape(-1)
    if pad:
        out_flat = out_flat[:total]
    return out_flat.reshape(orig_shape)


def early_dropout(x, *, rate, train_counter, end_step, seed, training=True):
    """Returns (output, new_train_counter). Mirrors EarlyDropout.forward.

    train_counter / end_step are host-side ints (like the PyTorch buffer,
    which is compared eagerly in forward), so identity regimes skip the
    kernel launch entirely.
    """
    if rate == 0.0 or not training:
        return x, train_counter
    if int(train_counter) >= int(end_step):
        # Post-end_step regime: identity, counter unchanged, no kernel launch.
        return x, train_counter
    new_counter = int(train_counter) + 1
    if rate >= 1.0:
        # p == 1.0 drops everything (avoids 1/(1-p) division by zero).
        return jnp.zeros_like(x), new_counter
    out = _dropout_pallas(x, rate=float(rate), seed=int(seed))
    return out, new_counter


if __name__ == "__main__":
    key = jax.random.PRNGKey(0)
    x = jax.random.normal(key, (2, 4, 16, 16), dtype=jnp.float32)

    rate = 0.5
    end_step = 10  # e.g. num_steps_per_epoch * end_epoch

    # Case 1: counter < end_step -> dropout applied, counter increments.
    y_drop, cnt1 = early_dropout(
        x, rate=rate, train_counter=0, end_step=end_step, seed=1234, training=True
    )
    y_drop = jax.block_until_ready(y_drop)
    assert int(cnt1) == 1

    # Survivors equal x / (1 - p); dropped elements are exactly 0.
    kept = y_drop != 0.0
    assert bool(
        jnp.allclose(
            jnp.where(kept, y_drop, 0.0),
            jnp.where(kept, x / (1.0 - rate), 0.0),
            atol=1e-6,
        )
    )
    keep_frac = float(jnp.mean(kept.astype(jnp.float32)))
    assert 0.3 < keep_frac < 0.7, keep_frac

    # Case 2: counter >= end_step -> identity, counter unchanged (no kernel).
    y_id, cnt2 = early_dropout(
        x, rate=rate, train_counter=end_step, end_step=end_step, seed=1234, training=True
    )
    y_id = jax.block_until_ready(y_id)
    assert int(cnt2) == end_step
    assert bool(jnp.array_equal(y_id, x))

    # Case 3: eval mode / rate 0 -> identity (pure Python fast path).
    y_eval, _ = early_dropout(
        x, rate=rate, train_counter=0, end_step=end_step, seed=1234, training=False
    )
    assert bool(jnp.array_equal(y_eval, x))

    print("KERNEL_OK")
</pallas_src>

<mosaic_0001>
module attributes {stable_mosaic.version = 11 : i64} {
  func.func @_dropout_kernel(%arg0: i32, %arg1: memref<1xi32, #tpu.memory_space<smem>>, %arg2: memref<1x2048xf32, #tpu.memory_space<vmem>>, %arg3: memref<1x2048xf32, #tpu.memory_space<vmem>>) attributes {dimension_semantics = [#tpu.dimension_semantics<parallel>], iteration_bounds = array<i64: 1>, scalar_prefetch = 1 : i64, scratch_operands = 0 : i64, tpu.core_type = #tpu.core_type<tc>, window_params = [{transform_indices = @transform_0, window_bounds = array<i64: 1, 2048>}, {transform_indices = @transform_1, window_bounds = array<i64: 1, 2048>}]} {
    %0 = tpu.iota {dimensions = array<i32: 0>} : vector<1x2048xi32>
    %1 = tpu.iota {dimensions = array<i32: 1>} : vector<1x2048xi32>
    %c1_i32 = arith.constant 1 : i32
    %2 = arith.muli %arg0, %c1_i32 : i32
    %3 = vector.broadcast %2 : i32 to vector<1x2048xi32>
    %4 = arith.addi %3, %0 : vector<1x2048xi32>
    %c2048_i32 = arith.constant 2048 : i32
    %5 = vector.broadcast %c2048_i32 : i32 to vector<1x2048xi32>
    %6 = arith.muli %4, %5 : vector<1x2048xi32>
    %7 = arith.addi %6, %1 : vector<1x2048xi32>
    %c-1640531527_i32 = arith.constant -1640531527 : i32
    %8 = vector.broadcast %c-1640531527_i32 : i32 to vector<1x2048xi32>
    %9 = arith.muli %7, %8 : vector<1x2048xi32>
    %c0 = arith.constant 0 : index
    %10 = memref.load %arg1[%c0] : memref<1xi32, #tpu.memory_space<smem>>
    %11 = vector.broadcast %10 : i32 to vector<1x2048xi32>
    %12 = arith.addi %9, %11 : vector<1x2048xi32>
    %c16_i32 = arith.constant 16 : i32
    %13 = vector.broadcast %c16_i32 : i32 to vector<1x2048xi32>
    %14 = arith.shrui %12, %13 : vector<1x2048xi32>
    %15 = arith.xori %12, %14 : vector<1x2048xi32>
    %c-2048144789_i32 = arith.constant -2048144789 : i32
    %16 = vector.broadcast %c-2048144789_i32 : i32 to vector<1x2048xi32>
    %17 = arith.muli %15, %16 : vector<1x2048xi32>
    %c13_i32 = arith.constant 13 : i32
    %18 = vector.broadcast %c13_i32 : i32 to vector<1x2048xi32>
    %19 = arith.shrui %17, %18 : vector<1x2048xi32>
    %20 = arith.xori %17, %19 : vector<1x2048xi32>
    %c-1028477387_i32 = arith.constant -1028477387 : i32
    %21 = vector.broadcast %c-1028477387_i32 : i32 to vector<1x2048xi32>
    %22 = arith.muli %20, %21 : vector<1x2048xi32>
    %c16_i32_0 = arith.constant 16 : i32
    %23 = vector.broadcast %c16_i32_0 : i32 to vector<1x2048xi32>
    %24 = arith.shrui %22, %23 : vector<1x2048xi32>
    %25 = arith.xori %22, %24 : vector<1x2048xi32>
    %c1_i32_1 = arith.constant 1 : i32
    %26 = vector.broadcast %c1_i32_1 : i32 to vector<1x2048xi32>
    %27 = arith.shrui %25, %26 : vector<1x2048xi32>
    %c1073741824_i32 = arith.constant 1073741824 : i32
    %28 = vector.broadcast %c1073741824_i32 : i32 to vector<1x2048xi32>
    %29 = arith.cmpi sge, %27, %28 : vector<1x2048xi32>
    %c0_2 = arith.constant 0 : index
    %c0_3 = arith.constant 0 : index
    %30 = vector.load %arg2[%c0_2, %c0_3] : memref<1x2048xf32, #tpu.memory_space<vmem>>, vector<1x2048xf32>
    %cst = arith.constant 2.000000e+00 : f32
    %31 = vector.broadcast %cst : f32 to vector<1x2048xf32>
    %32 = arith.mulf %30, %31 : vector<1x2048xf32>
    %cst_4 = arith.constant 0.000000e+00 : f32
    %33 = vector.broadcast %cst_4 : f32 to vector<1x2048xf32>
    %34 = arith.select %29, %32, %33 : vector<1x2048xi1>, vector<1x2048xf32>
    %c0_5 = arith.constant 0 : index
    %c0_6 = arith.constant 0 : index
    %35 = vector.load %arg3[%c0_5, %c0_6] : memref<1x2048xf32, #tpu.memory_space<vmem>>, vector<1x2048xf32>
    tpu.vector_store %arg3[%c0_5, %c0_6], %34 {strides = array<i32>} : memref<1x2048xf32, #tpu.memory_space<vmem>>, vector<1x2048xf32>,
    return
  }
  func.func @transform_0(%arg0: i32, %arg1: memref<1xi32, #tpu.memory_space<smem>>) -> (i32, i32) {
    %c0_i32 = arith.constant 0 : i32
    %c0_i32_0 = arith.constant 0 : i32
    return %arg0, %c0_i32 : i32, i32
  }
  func.func @transform_1(%arg0: i32, %arg1: memref<1xi32, #tpu.memory_space<smem>>) -> (i32, i32) {
    %c0_i32 = arith.constant 0 : i32
    %c0_i32_0 = arith.constant 0 : i32
    return %arg0, %c0_i32 : i32, i32
  }
}

</mosaic_0001>

<bundles_post_ra>
// kernel: tpu_custom_call.1
= control target key start
LH: loop header
LB: loop body
LE: loop exit
PB: predicated region body
PF: predicated region fallthrough
CT: control target
= control target key end

     0   :  { %8 = vsyncpa [#allocation5], 0  ;;  %s567_s0 = inlined_call_operand.<no memory space> [shape: s32[1], index: 0, kind: input, shape index: {}]   ;;  %s568_s1 = inlined_call_operand.hbm [shape: f32[1,2048], index: 1, kind: input, shape index: {}]   ;;  %s569_s2 = inlined_call_operand.hbm [shape: f32[1,2048], index: 2, kind: output, shape index: {}]  }
   0x1   :  { %9 = vsyncpa [#allocation6], 0  ;;  %s15_s11 = sshll.u32 %s568_s1, 4  ;;  %s437_s12 = smov [#allocation4]   ;;  %s16_s11 = int_to_ptr.hbm [resolvable:$true] %s15_s11 }
   0x2   :  { %s17_s13 = sshll.u32 %s437_s12, 4  ;;  %s18_s13 = int_to_ptr.vmem [resolvable:$true] %s17_s13 }
   0x3   :  { %20 = dma.hbm_to_vmem [thread:$0]  %s16_s11, 256, %s18_s13, [#allocation5]  }
   0x4   :  { %433 = dma.done.wait [#allocation5], 256  }
   0x5   :  { %434 = vsyncadd [#allocation5], 4294967040  ;;  %v25_v0 = vlaneseq  ;;  %v80_v11 = vstv %s567_s0  ;;  %s438_s0 = smov [#allocation7]   ;;  %s373_s18 = sshll.u32 %s569_s2, 4  ;;  %s374_s18 = int_to_ptr.hbm [resolvable:$true] %s373_s18 }
   0x6   :  { %s371_s15 = sshll.u32 %s438_s0, 4  ;;  %s372_s15 = int_to_ptr.vmem [resolvable:$true] %s371_s15 }
   0x7   :  { %v28_v1 = vand.u32 127, %v25_v0  ;;  %v26_v2 = vshrl.u32 %v25_v0, 7 }
   0x9   :  { %v29_v3 = vadd.s32 128, %v28_v1  ;;  %v30_v4 = vadd.s32 256, %v28_v1  ;;  %v31_v5 = vadd.s32 384, %v28_v1  ;;  %v32_v6 = vadd.s32 512, %v28_v1 }
   0xa   :  { %v46_v7 = vmul.u32 2048, %v26_v2  ;;  %v33_v8 = vadd.s32 640, %v28_v1  ;;  %v34_v9 = vadd.s32 768, %v28_v1  ;;  %v35_v10 = vadd.s32 896, %v28_v1 }
   0xb   :  { %v36_v12 = vadd.s32 1024, %v28_v1  ;;  %v37_v13 = vadd.s32 1152, %v28_v1  ;;  %v38_v14 = vadd.s32 1280, %v28_v1  ;;  %v39_v15 = vadd.s32 1408, %v28_v1 }
   0xc   :  { %v40_v16 = vadd.s32 1536, %v28_v1  ;;  %v41_v17 = vadd.s32 1664, %v28_v1  ;;  %v47_v18 = vadd.s32 %v46_v7, %v28_v1  ;;  %v48_v19 = vadd.s32 %v46_v7, %v29_v3 }
   0xd   :  { %v42_v20 = vadd.s32 1792, %v28_v1  ;;  %v49_v21 = vadd.s32 %v46_v7, %v30_v4  ;;  %v50_v22 = vadd.s32 %v46_v7, %v31_v5  ;;  %v51_v23 = vadd.s32 %v46_v7, %v32_v6 }
   0xe   :  { %v43_v24 = vadd.s32 1920, %v28_v1  ;;  %v52_v25 = vadd.s32 %v46_v7, %v33_v8  ;;  %v53_v26 = vadd.s32 %v46_v7, %v34_v9  ;;  %v54_v27 = vadd.s32 %v46_v7, %v35_v10 }
   0xf   :  { %v55_v28 = vadd.s32 %v46_v7, %v36_v12  ;;  %v56_v29 = vadd.s32 %v46_v7, %v37_v13  ;;  %v57_v30 = vadd.s32 %v46_v7, %v38_v14  ;;  %v58_v31 = vadd.s32 %v46_v7, %v39_v15 }
  0x10   :  { %v59_v32 = vadd.s32 %v46_v7, %v40_v16  ;;  %v60_v33 = vadd.s32 %v46_v7, %v41_v17  ;;  %v63_v34 = vmul.u32 2654435769, %v47_v18  ;;  %v64_v35 = vmul.u32 2654435769, %v48_v19 }
  0x11   :  { %v61_v36 = vadd.s32 %v46_v7, %v42_v20  ;;  %v65_v37 = vmul.u32 2654435769, %v49_v21  ;;  %v66_v38 = vmul.u32 2654435769, %v50_v22  ;;  %v67_v39 = vmul.u32 2654435769, %v51_v23 }
  0x12   :  { %v62_v40 = vadd.s32 %v46_v7, %v43_v24  ;;  %v68_v41 = vmul.u32 2654435769, %v52_v25  ;;  %v69_v42 = vmul.u32 2654435769, %v53_v26  ;;  %v70_v43 = vmul.u32 2654435769, %v54_v27 }
  0x13   :  { %v71_v44 = vmul.u32 2654435769, %v55_v28  ;;  %v72_v45 = vmul.u32 2654435769, %v56_v29  ;;  %v73_v46 = vmul.u32 2654435769, %v57_v30  ;;  %v81_v50 = vadd.s32 %v80_v11, %v63_v34 }
  0x14   :  { %v74_v47 = vmul.u32 2654435769, %v58_v31  ;;  %v75_v48 = vmul.u32 2654435769, %v59_v32  ;;  %v76_v49 = vmul.u32 2654435769, %v60_v33  ;;  %v82_v52 = vadd.s32 %v80_v11, %v64_v35 }
  0x15   :  { %v77_v51 = vmul.u32 2654435769, %v61_v36  ;;  %v83_v53 = vadd.s32 %v80_v11, %v65_v37  ;;  %v84_v54 = vadd.s32 %v80_v11, %v66_v38  ;;  %v78_v55 = vmul.u32 2654435769, %v62_v40 }
  0x16   :  { %v85_v56 = vadd.s32 %v80_v11, %v67_v39  ;;  %v86_v57 = vadd.s32 %v80_v11, %v68_v41  ;;  %v87_v58 = vadd.s32 %v80_v11, %v69_v42  ;;  %v88_v59 = vadd.s32 %v80_v11, %v70_v43 }
  0x17   :  { %v89_v60 = vadd.s32 %v80_v11, %v71_v44  ;;  %v90_v61 = vadd.s32 %v80_v11, %v72_v45  ;;  %v91_v62 = vadd.s32 %v80_v11, %v73_v46  ;;  %v92_v63 = vadd.s32 %v80_v11, %v74_v47 }
  0x18   :  { %v93_v0 = vadd.s32 %v80_v11, %v75_v48  ;;  %v94_v1 = vadd.s32 %v80_v11, %v76_v49  ;;  %v97_v2 = vshrl.u32 %v81_v50, 16  ;;  %v95_v3 = vadd.s32 %v80_v11, %v77_v51 }
  0x19   :  { %v98_v4 = vshrl.u32 %v82_v52, 16  ;;  %v99_v5 = vshrl.u32 %v83_v53, 16  ;;  %v100_v6 = vshrl.u32 %v84_v54, 16  ;;  %v96_v7 = vadd.s32 %v80_v11, %v78_v55 }
  0x1a   :  { %v101_v8 = vshrl.u32 %v85_v56, 16  ;;  %v102_v9 = vshrl.u32 %v86_v57, 16  ;;  %v103_v10 = vshrl.u32 %v87_v58, 16  ;;  %v104_v12 = vshrl.u32 %v88_v59, 16 }
  0x1b   :  { %v105_v13 = vshrl.u32 %v89_v60, 16  ;;  %v106_v14 = vshrl.u32 %v90_v61, 16  ;;  %v107_v15 = vshrl.u32 %v91_v62, 16  ;;  %v108_v16 = vshrl.u32 %v92_v63, 16 }
  0x1c   :  { %v109_v17 = vshrl.u32 %v93_v0, 16  ;;  %v110_v18 = vshrl.u32 %v94_v1, 16  ;;  %v113_v19 = vxor.u32 %v97_v2, %v81_v50  ;;  %v111_v20 = vshrl.u32 %v95_v3, 16 }
  0x1d   :  { %v114_v21 = vxor.u32 %v98_v4, %v82_v52  ;;  %v115_v22 = vxor.u32 %v99_v5, %v83_v53  ;;  %v116_v23 = vxor.u32 %v100_v6, %v84_v54  ;;  %v112_v24 = vshrl.u32 %v96_v7, 16 }
  0x1e   :  { %v117_v25 = vxor.u32 %v101_v8, %v85_v56  ;;  %v118_v26 = vxor.u32 %v102_v9, %v86_v57  ;;  %v119_v27 = vxor.u32 %v103_v10, %v87_v58  ;;  %v120_v11 = vxor.u32 %v104_v12, %v88_v59 }
  0x1f   :  { %v121_v28 = vxor.u32 %v105_v13, %v89_v60  ;;  %v122_v29 = vxor.u32 %v106_v14, %v90_v61  ;;  %v123_v30 = vxor.u32 %v107_v15, %v91_v62  ;;  %v124_v31 = vxor.u32 %v108_v16, %v92_v63 }
  0x20   :  { %v125_v32 = vxor.u32 %v109_v17, %v93_v0  ;;  %v126_v33 = vxor.u32 %v110_v18, %v94_v1  ;;  %v129_v34 = vmul.u32 2246822507, %v113_v19  ;;  %v127_v35 = vxor.u32 %v111_v20, %v95_v3 }
  0x21   :  { %v130_v36 = vmul.u32 2246822507, %v114_v21  ;;  %v131_v37 = vmul.u32 2246822507, %v115_v22  ;;  %v132_v38 = vmul.u32 2246822507, %v116_v23  ;;  %v128_v39 = vxor.u32 %v112_v24, %v96_v7 }
  0x22   :  { %v133_v40 = vmul.u32 2246822507, %v117_v25  ;;  %v134_v41 = vmul.u32 2246822507, %v118_v26  ;;  %v135_v42 = vmul.u32 2246822507, %v119_v27 }
  0x23   :  { %v136_v43 = vmul.u32 2246822507, %v120_v11  ;;  %v137_v44 = vmul.u32 2246822507, %v121_v28  ;;  %v138_v45 = vmul.u32 2246822507, %v122_v29 }
  0x24   :  { %v139_v46 = vmul.u32 2246822507, %v123_v30  ;;  %v140_v47 = vmul.u32 2246822507, %v124_v31  ;;  %v141_v48 = vmul.u32 2246822507, %v125_v32 }
  0x25   :  { %v142_v49 = vmul.u32 2246822507, %v126_v33  ;;  %v143_v50 = vmul.u32 2246822507, %v127_v35  ;;  %v145_v51 = vshrl.u32 %v129_v34, 13  ;;  %v146_v52 = vshrl.u32 %v130_v36, 13 }
  0x26   :  { %v144_v53 = vmul.u32 2246822507, %v128_v39  ;;  %v147_v54 = vshrl.u32 %v131_v37, 13  ;;  %v148_v55 = vshrl.u32 %v132_v38, 13  ;;  %v149_v56 = vshrl.u32 %v133_v40, 13 }
  0x27   :  { %v150_v57 = vshrl.u32 %v134_v41, 13  ;;  %v151_v58 = vshrl.u32 %v135_v42, 13  ;;  %v152_v59 = vshrl.u32 %v136_v43, 13  ;;  %v153_v60 = vshrl.u32 %v137_v44, 13 }
  0x28   :  { %v154_v61 = vshrl.u32 %v138_v45, 13  ;;  %v155_v62 = vshrl.u32 %v139_v46, 13  ;;  %v156_v63 = vshrl.u32 %v140_v47, 13  ;;  %v157_v0 = vshrl.u32 %v141_v48, 13 }
  0x29   :  { %v158_v1 = vshrl.u32 %v142_v49, 13  ;;  %v159_v2 = vshrl.u32 %v143_v50, 13  ;;  %v161_v3 = vxor.u32 %v145_v51, %v129_v34  ;;  %v162_v4 = vxor.u32 %v146_v52, %v130_v36 }
  0x2a   :  { %v160_v5 = vshrl.u32 %v144_v53, 13  ;;  %v163_v6 = vxor.u32 %v147_v54, %v131_v37  ;;  %v164_v7 = vxor.u32 %v148_v55, %v132_v38  ;;  %v165_v8 = vxor.u32 %v149_v56, %v133_v40 }
  0x2b   :  { %v166_v9 = vxor.u32 %v150_v57, %v134_v41  ;;  %v167_v10 = vxor.u32 %v151_v58, %v135_v42  ;;  %v168_v12 = vxor.u32 %v152_v59, %v136_v43  ;;  %v169_v13 = vxor.u32 %v153_v60, %v137_v44 }
  0x2c   :  { %v170_v14 = vxor.u32 %v154_v61, %v138_v45  ;;  %v171_v15 = vxor.u32 %v155_v62, %v139_v46  ;;  %v172_v16 = vxor.u32 %v156_v63, %v140_v47  ;;  %v173_v17 = vxor.u32 %v157_v0, %v141_v48 }
  0x2d   :  { %v174_v18 = vxor.u32 %v158_v1, %v142_v49  ;;  %v175_v19 = vxor.u32 %v159_v2, %v143_v50  ;;  %v177_v20 = vmul.u32 3266489909, %v161_v3  ;;  %v178_v21 = vmul.u32 3266489909, %v162_v4 }
  0x2e   :  { %v176_v22 = vxor.u32 %v160_v5, %v144_v53  ;;  %v179_v23 = vmul.u32 3266489909, %v163_v6  ;;  %v180_v24 = vmul.u32 3266489909, %v164_v7  ;;  %v181_v25 = vmul.u32 3266489909, %v165_v8 }
  0x2f   :  { %v182_v26 = vmul.u32 3266489909, %v166_v9  ;;  %v183_v27 = vmul.u32 3266489909, %v167_v10  ;;  %v184_v11 = vmul.u32 3266489909, %v168_v12 }
  0x30   :  { %v185_v28 = vmul.u32 3266489909, %v169_v13  ;;  %v186_v29 = vmul.u32 3266489909, %v170_v14  ;;  %v187_v30 = vmul.u32 3266489909, %v171_v15 }
  0x31   :  { %v188_v31 = vmul.u32 3266489909, %v172_v16  ;;  %v189_v32 = vmul.u32 3266489909, %v173_v17  ;;  %v190_v33 = vmul.u32 3266489909, %v174_v18 }
  0x32   :  { %v191_v34 = vmul.u32 3266489909, %v175_v19  ;;  %v192_v35 = vmul.u32 3266489909, %v176_v22  ;;  %v193_v36 = vshrl.u32 %v177_v20, 16  ;;  %v194_v37 = vshrl.u32 %v178_v21, 16 }
  0x33   :  { %v195_v38 = vshrl.u32 %v179_v23, 16  ;;  %v196_v39 = vshrl.u32 %v180_v24, 16  ;;  %v197_v40 = vshrl.u32 %v181_v25, 16  ;;  %v198_v41 = vshrl.u32 %v182_v26, 16 }
  0x34   :  { %v199_v42 = vshrl.u32 %v183_v27, 16  ;;  %v200_v43 = vshrl.u32 %v184_v11, 16  ;;  %v201_v44 = vshrl.u32 %v185_v28, 16  ;;  %v202_v45 = vshrl.u32 %v186_v29, 16 }
  0x35   :  { %v203_v46 = vshrl.u32 %v187_v30, 16  ;;  %v204_v47 = vshrl.u32 %v188_v31, 16  ;;  %v205_v48 = vshrl.u32 %v189_v32, 16  ;;  %v206_v49 = vshrl.u32 %v190_v33, 16 }
  0x36   :  { %v207_v50 = vshrl.u32 %v191_v34, 16  ;;  %v208_v51 = vshrl.u32 %v192_v35, 16  ;;  %v209_v52 = vxor.u32 %v193_v36, %v177_v20  ;;  %v210_v53 = vxor.u32 %v194_v37, %v178_v21 }
  0x37   :  { %v211_v54 = vxor.u32 %v195_v38, %v179_v23  ;;  %v212_v55 = vxor.u32 %v196_v39, %v180_v24  ;;  %v213_v56 = vxor.u32 %v197_v40, %v181_v25  ;;  %v214_v57 = vxor.u32 %v198_v41, %v182_v26  ;;  %v257_v23 = vld [vmem:[#allocation4] sm:$0xff]  ;;  %v258_v24 = vld [vmem:[#allocation4 + $0x8] sm:$0xff] }
  0x38   :  { %v215_v58 = vxor.u32 %v199_v42, %v183_v27  ;;  %v216_v59 = vxor.u32 %v200_v43, %v184_v11  ;;  %v217_v60 = vxor.u32 %v201_v44, %v185_v28  ;;  %v218_v61 = vxor.u32 %v202_v45, %v186_v29 }
  0x39   :  { %v219_v62 = vxor.u32 %v203_v46, %v187_v30  ;;  %v220_v63 = vxor.u32 %v204_v47, %v188_v31  ;;  %v221_v0 = vxor.u32 %v205_v48, %v189_v32  ;;  %v222_v1 = vxor.u32 %v206_v49, %v190_v33 }
  0x3a   :  { %v223_v2 = vxor.u32 %v207_v50, %v191_v34  ;;  %v224_v3 = vxor.u32 %v208_v51, %v192_v35  ;;  %v225_v4 = vshrl.u32 %v209_v52, 1  ;;  %v226_v5 = vshrl.u32 %v210_v53, 1 }
  0x3b   :  { %v227_v6 = vshrl.u32 %v211_v54, 1  ;;  %v228_v7 = vshrl.u32 %v212_v55, 1  ;;  %v229_v8 = vshrl.u32 %v213_v56, 1  ;;  %v230_v9 = vshrl.u32 %v214_v57, 1 }
  0x3c   :  { %v231_v10 = vshrl.u32 %v215_v58, 1  ;;  %v232_v12 = vshrl.u32 %v216_v59, 1  ;;  %v233_v13 = vshrl.u32 %v217_v60, 1  ;;  %v234_v14 = vshrl.u32 %v218_v61, 1 }
  0x3d   :  { %v235_v15 = vshrl.u32 %v219_v62, 1  ;;  %v236_v16 = vshrl.u32 %v220_v63, 1  ;;  %v237_v17 = vshrl.u32 %v221_v0, 1  ;;  %v238_v18 = vshrl.u32 %v222_v1, 1 }
  0x3e   :  { %v239_v19 = vshrl.u32 %v223_v2, 1  ;;  %v240_v20 = vshrl.u32 %v224_v3, 1  ;;  %vm460_vm0 = vcmp.ge.s32.totalorder %v225_v4, 1073741824  ;;  %vm464_vm1 = vcmp.ge.s32.totalorder %v226_v5, 1073741824 }
  0x3f   :  { %vm468_vm2 = vcmp.ge.s32.totalorder %v227_v6, 1073741824  ;;  %vm472_vm3 = vcmp.ge.s32.totalorder %v228_v7, 1073741824  ;;  %vm476_vm4 = vcmp.ge.s32.totalorder %v229_v8, 1073741824  ;;  %vm480_vm5 = vcmp.ge.s32.totalorder %v230_v9, 1073741824 }
  0x40   :  { %vm484_vm6 = vcmp.ge.s32.totalorder %v231_v10, 1073741824  ;;  %vm488_vm7 = vcmp.ge.s32.totalorder %v232_v12, 1073741824  ;;  %vm492_vm8 = vcmp.ge.s32.totalorder %v233_v13, 1073741824  ;;  %vm496_vm9 = vcmp.ge.s32.totalorder %v234_v14, 1073741824 }
  0x41   :  { %vm500_vm10 = vcmp.ge.s32.totalorder %v235_v15, 1073741824  ;;  %v590_v32 = vmov 0  ;;  %vm504_vm11 = vcmp.ge.s32.totalorder %v236_v16, 1073741824  ;;  %v592_v33 = vmov 0 }
  0x42   :  { %v591_v32 = vsel %vm500_vm10, 4294967295, %v590_v32  ;;  %v593_v33 = vsel %vm504_vm11, 4294967295, %v592_v33  ;;  %v259_v34 = vmul.f32 2.0, %v257_v23  ;;  %v260_v35 = vmul.f32 2.0, %v258_v24 }
  0x43   :  { %vm508_vm12 = vcmp.ge.s32.totalorder %v237_v17, 1073741824  ;;  %v594_v36 = vmov 0  ;;  %vm512_vm13 = vcmp.ge.s32.totalorder %v238_v18, 1073741824  ;;  %v596_v37 = vmov 0 }
  0x44   :  { %v595_v36 = vsel %vm508_vm12, 4294967295, %v594_v36  ;;  %v597_v37 = vsel %vm512_vm13, 4294967295, %v596_v37  ;;  %vm516_vm14 = vcmp.ge.s32.totalorder %v239_v19, 1073741824  ;;  %vm520_vm15 = vcmp.ge.s32.totalorder %v240_v20, 1073741824 }
  0x45   :  { %v263_v40 = vperm.slane %v259_v34, 0  ;;  %v264_v41 = vperm.slane %v259_v34, 1  ;;  %v265_v42 = vperm.slane %v259_v34, 2  ;;  %v266_v43 = vperm.slane %v259_v34, 3 }
  0x46   :  { %vm341_vm11 = vcmask 1040384   ;;  %vm343_vm10 = vcmask 1042434   ;;  %v267_v44 = vperm.slane %v259_v34, 4  ;;  %v268_v45 = vperm.slane %v259_v34, 5 }
  0x47   :  { %v269_v46 = vperm.slane %v259_v34, 6  ;;  %v270_v47 = vperm.slane %v259_v34, 7  ;;  %vm345_vm12 = vcmask 1041408   ;;  %vm347_vm13 = vcmask 1044484  }
  0x48   :  { %v271_v48 = vperm.slane %v260_v35, 0  ;;  %v272_v49 = vperm.slane %v260_v35, 1  ;;  %v273_v50 = vperm.slane %v260_v35, 2  ;;  %v274_v51 = vperm.slane %v260_v35, 3 }
  0x49   :  { %v275_v52 = vperm.slane %v260_v35, 4  ;;  %v276_v53 = vperm.slane %v260_v35, 5  ;;  %v277_v54 = vperm.slane %v260_v35, 6  ;;  %v278_v55 = vperm.slane %v260_v35, 7 }
  0x4a   :  { %v295_v56 = vsel %vm460_vm0, %v263_v40, 0.0  ;;  %v296_v57 = vsel %vm464_vm1, %v264_v41, 0.0  ;;  %v297_v58 = vsel %vm468_vm2, %v265_v42, 0.0  ;;  %v298_v59 = vsel %vm472_vm3, %v266_v43, 0.0 }
  0x4b   :  { %v299_v60 = vsel %vm476_vm4, %v267_v44, 0.0  ;;  %v300_v61 = vsel %vm480_vm5, %v268_v45, 0.0  ;;  %v301_v62 = vsel %vm484_vm6, %v269_v46, 0.0  ;;  %v302_v63 = vsel %vm488_vm7, %v270_v47, 0.0 }
  0x4c   :  { %v303_v0 = vsel %vm492_vm8, %v271_v48, 0.0  ;;  %v304_v1 = vsel %vm496_vm9, %v272_v49, 0.0  ;;  %vm602_vm0 = vnez %v591_v32  ;;  %vm603_vm1 = vnez %v593_v33 }
  0x4d   :  { %v305_v2 = vsel %vm602_vm0, %v273_v50, 0.0  ;;  %v306_v3 = vsel %vm603_vm1, %v274_v51, 0.0  ;;  %vm604_vm2 = vnez %v595_v36  ;;  %vm605_vm3 = vnez %v597_v37 }
  0x4e   :  { %v307_v4 = vsel %vm604_vm2, %v275_v52, 0.0  ;;  %v308_v5 = vsel %vm605_vm3, %v276_v53, 0.0  ;;  %v309_v6 = vsel %vm516_vm14, %v277_v54, 0.0  ;;  %v310_v7 = vsel %vm520_vm15, %v278_v55, 0.0 }
  0x4f   :  { %v327_v8 = vrot.slane %v296_v57, 7  ;;  %v328_v9 = vrot.slane %v297_v58, 6  ;;  %v329_v10 = vrot.slane %v298_v59, 5  ;;  %v330_v12 = vrot.slane %v299_v60, 4 }
  0x50   :  { %v331_v13 = vrot.slane %v300_v61, 3  ;;  %v332_v14 = vrot.slane %v301_v62, 2  ;;  %v333_v15 = vrot.slane %v302_v63, 1  ;;  %v334_v16 = vrot.slane %v304_v1, 7 }
  0x51   :  { %v335_v17 = vrot.slane %v305_v2, 6  ;;  %v336_v18 = vrot.slane %v306_v3, 5  ;;  %v337_v19 = vrot.slane %v307_v4, 4  ;;  %v338_v20 = vrot.slane %v308_v5, 3 }
  0x52   :  { %v339_v21 = vrot.slane %v309_v6, 2  ;;  %v340_v22 = vrot.slane %v310_v7, 1  ;;  %v342_v23 = vsel %vm341_vm11, %v295_v56, %v327_v8  ;;  %v344_v24 = vsel %vm343_vm10, %v328_v9, %v329_v10 }
  0x53   :  { %v346_v25 = vsel %vm345_vm12, %v342_v23, %v344_v24  ;;  %v348_v26 = vsel %vm347_vm13, %v330_v12, %v331_v13  ;;  %vm349_vm4 = vcmask 1046534   ;;  %vm351_vm5 = vcmask 1045508  }
  0x54   :  { %v350_v27 = vsel %vm349_vm4, %v332_v14, %v333_v15  ;;  %vm353_vm6 = vcmask 1043456   ;;  %v355_v11 = vsel %vm341_vm11, %v303_v0, %v334_v16  ;;  %v356_v28 = vsel %vm343_vm10, %v335_v17, %v336_v18 }
  0x55   :  { %v352_v29 = vsel %vm351_vm5, %v348_v26, %v350_v27  ;;  %v357_v30 = vsel %vm345_vm12, %v355_v11, %v356_v28  ;;  %v358_v31 = vsel %vm347_vm13, %v337_v19, %v338_v20  ;;  %v359_v32 = vsel %vm349_vm4, %v339_v21, %v340_v22 }
  0x56   :  { %v354_v33 = vsel %vm353_vm6, %v346_v25, %v352_v29  ;;  %v360_v34 = vsel %vm351_vm5, %v358_v31, %v359_v32 }
  0x57   :  { %v361_v35 = vsel %vm353_vm6, %v357_v30, %v360_v34  ;;  %364 = vst [vmem:[#allocation7] sm:$0xff] %v354_v33 }
  0x58   :  { %365 = vst [vmem:[#allocation7 + $0x8] sm:$0xff] %v361_v35 }
  0x59   :  { %376 = dma.vmem_to_hbm [thread:$0]  %s372_s15, 256, %s374_s18, [#allocation6]  }
  0x5a   :  { %435 = dma.done.wait [#allocation6], 256  }
  0x5b   :  { %436 = vsyncadd [#allocation6], 4294967040 }
  0x5c   :  { %381 = vsyncpa [#allocation5], 1 }
  0x5d   :  { %382 = vsyncpa [#allocation6], 1 }

</bundles_post_ra>
